<compile_context>
chip_gen: v6e
topology: v6e:2x2x1
jax: 0.10.0
libtpu: 0.0.40
codegen_flags: <defaults>
</compile_context>

<pallas_src>
import jax
import jax.numpy as jnp
from jax.experimental import pallas as pl
from jax.experimental.pallas import tpu as pltpu

MODEL_DIM = 64
HIDDEN_DIM = 4 * MODEL_DIM
DROPOUT_P = 0.2  # unused (eval mode)


def _cdiv(a, b):
    return -(-a // b)


def _round_up(a, m):
    return _cdiv(a, m) * m


def _ffn_kernel(x_ref, w1_ref, b1_ref, w2_ref, b2_ref, o_ref):
    # x_ref : (tm, 2C)  two tokens packed per 128-lane row, f32
    # w1_ref: (2C, 2H)  block-diag(W1^T, W1^T), bf16
    # b1_ref: (1, 2H)   [b1, b1], f32
    # w2_ref: (2H, 2C)  block-diag(W2^T, W2^T), bf16
    # b2_ref: (1, 2C)   [b2, b2], f32
    # o_ref : (tm, 2C)
    x = x_ref[...]
    h = jnp.dot(x.astype(jnp.bfloat16), w1_ref[...],
                preferred_element_type=jnp.float32)
    h = jnp.maximum(h + b1_ref[...], 0.0)          # bias + ReLU in f32 (v5e-safe)
    y = jnp.dot(h.astype(jnp.bfloat16), w2_ref[...],
                preferred_element_type=jnp.float32)
    # Dropout: identity in eval mode.
    o_ref[...] = (y + b2_ref[...]).astype(o_ref.dtype)


def prepare_params(params):
    """One-time layout prep: PyTorch (out,in) weights -> lane-dense kernel operands.

    Done once outside the forward path so no per-call transpose/reshape ops
    are emitted ahead of the kernel.
    """
    H, C = params["w1"].shape                      # (hidden, model)
    w1t = jnp.asarray(params["w1"]).T.astype(jnp.bfloat16)   # (C, H)
    w2t = jnp.asarray(params["w2"]).T.astype(jnp.bfloat16)   # (H, C)
    z1 = jnp.zeros_like(w1t)
    z2 = jnp.zeros_like(w2t)
    w1_bd = jnp.block([[w1t, z1], [z1, w1t]])      # (2C, 2H) block-diagonal
    w2_bd = jnp.block([[w2t, z2], [z2, w2t]])      # (2H, 2C) block-diagonal
    b1_bd = jnp.tile(params["b1"].astype(jnp.float32).reshape(1, H), (1, 2))
    b2_bd = jnp.tile(params["b2"].astype(jnp.float32).reshape(1, C), (1, 2))
    return {"w1_bd": w1_bd, "b1_bd": b1_bd, "w2_bd": w2_bd, "b2_bd": b2_bd,
            "model_dim": C, "hidden_dim": H}


def feed_forward(x, prepared, *, block_rows=2048):
    """Fused MLP forward matching the PyTorch FeedForwardLayer (eval mode).

    `prepared` comes from prepare_params(). `block_rows` is in pair-rows
    (2 tokens each); sweep {1024, 2048, 4096} for large token counts.
    """
    orig_shape = x.shape
    C = prepared["model_dim"]
    H = prepared["hidden_dim"]
    assert orig_shape[-1] == C

    x2d = x.reshape(-1, C)
    M = x2d.shape[0]

    # Pack two consecutive tokens per 128-lane row (row-major reshape is free).
    M_pad = _round_up(M, 2)
    if M_pad != M:
        x2d = jnp.pad(x2d, ((0, M_pad - M), (0, 0)))
    Mp = M_pad // 2
    xp = x2d.reshape(Mp, 2 * C)

    # Row tiling: one step for small inputs; otherwise big tiles (multiple of 8)
    # with >= 2 grid steps so v7x can use both TensorCores on the parallel axis.
    if Mp <= 512:
        tm = Mp                                    # full-extent block, single step
    else:
        tm = min(block_rows, _round_up(_cdiv(Mp, 2), 8))
    grid = (_cdiv(Mp, tm),)

    # Note: weights/biases are grid-resident (constant index_map) so they are
    # DMA'd once; default buffering kept for portability across jax versions.
    out = pl.pallas_call(
        _ffn_kernel,
        out_shape=jax.ShapeDtypeStruct((Mp, 2 * C), x.dtype),
        grid_spec=pltpu.PrefetchScalarGridSpec(
            num_scalar_prefetch=0,
            grid=grid,
            in_specs=[
                pl.BlockSpec((tm, 2 * C), lambda i: (i, 0)),     # activations (streamed)
                pl.BlockSpec((2 * C, 2 * H), lambda i: (0, 0)),  # W1 block-diag (resident)
                pl.BlockSpec((1, 2 * H), lambda i: (0, 0)),      # b1
                pl.BlockSpec((2 * H, 2 * C), lambda i: (0, 0)),  # W2 block-diag (resident)
                pl.BlockSpec((1, 2 * C), lambda i: (0, 0)),      # b2
            ],
            out_specs=pl.BlockSpec((tm, 2 * C), lambda i: (i, 0)),
        ),
        compiler_params=pltpu.CompilerParams(
            dimension_semantics=("parallel",),
            vmem_limit_bytes=48 * 1024 * 1024,
        ),
    )(xp, prepared["w1_bd"], prepared["b1_bd"],
      prepared["w2_bd"], prepared["b2_bd"])

    out = out.reshape(M_pad, C)
    if M_pad != M:
        out = out[:M]
    return out.reshape(orig_shape)


def init_params(key, model_dim=MODEL_DIM, hidden_dim=HIDDEN_DIM):
    k1, k2, k3, k4 = jax.random.split(key, 4)
    return {
        # PyTorch nn.Linear convention: weight is (out_features, in_features).
        "w1": jax.random.normal(k1, (hidden_dim, model_dim), jnp.float32)
              * (model_dim ** -0.5),
        "b1": jax.random.normal(k2, (hidden_dim,), jnp.float32) * 0.01,
        "w2": jax.random.normal(k3, (model_dim, hidden_dim), jnp.float32)
              * (hidden_dim ** -0.5),
        "b2": jax.random.normal(k4, (model_dim,), jnp.float32) * 0.01,
    }


def _reference(x, params):
    """Pure-JAX f32 reference mirroring the PyTorch forward (eval mode)."""
    h = jnp.maximum(x @ params["w1"].T + params["b1"], 0.0)
    return h @ params["w2"].T + params["b2"]


if __name__ == "__main__":
    key = jax.random.PRNGKey(0)
    k_param, k_x = jax.random.split(key)

    B, T = 2, 8  # batch=2, seq=8, model_dim=64 -> 16 tokens total
    params = init_params(k_param)
    prepared = prepare_params(params)
    x = jax.random.normal(k_x, (B, T, MODEL_DIM), jnp.float32)

    out = feed_forward(x, prepared)
    out = jax.block_until_ready(out)

    ref = _reference(x, params)
    assert out.shape == (B, T, MODEL_DIM)
    # bf16 MXU operands with f32 accumulation vs all-f32 reference: ~1e-2 rel error.
    err = float(jnp.max(jnp.abs(out - ref)))
    assert jnp.allclose(out, ref, atol=5e-2, rtol=5e-2), f"max abs err {err}"

    print("KERNEL_OK")
</pallas_src>

<mosaic_0001>
module attributes {stable_mosaic.version = 11 : i64} {
  func.func @_ffn_kernel(%arg0: i32, %arg1: memref<8x128xf32, #tpu.memory_space<vmem>>, %arg2: memref<128x512xbf16, #tpu.memory_space<vmem>>, %arg3: memref<1x512xf32, #tpu.memory_space<vmem>>, %arg4: memref<512x128xbf16, #tpu.memory_space<vmem>>, %arg5: memref<1x128xf32, #tpu.memory_space<vmem>>, %arg6: memref<8x128xf32, #tpu.memory_space<vmem>>) attributes {dimension_semantics = [#tpu.dimension_semantics<parallel>], iteration_bounds = array<i64: 1>, scalar_prefetch = 0 : i64, scratch_operands = 0 : i64, tpu.core_type = #tpu.core_type<tc>, window_params = [{transform_indices = @transform_0, window_bounds = array<i64: 8, 128>}, {pipeline_mode = #tpu.pipeline_mode<synchronous>, transform_indices = @transform_1, window_bounds = array<i64: 128, 512>}, {pipeline_mode = #tpu.pipeline_mode<synchronous>, transform_indices = @transform_2, window_bounds = array<i64: 1, 512>}, {pipeline_mode = #tpu.pipeline_mode<synchronous>, transform_indices = @transform_3, window_bounds = array<i64: 512, 128>}, {pipeline_mode = #tpu.pipeline_mode<synchronous>, transform_indices = @transform_4, window_bounds = array<i64: 1, 128>}, {transform_indices = @transform_5, window_bounds = array<i64: 8, 128>}]} {
    %c0 = arith.constant 0 : index
    %c0_0 = arith.constant 0 : index
    %0 = vector.load %arg1[%c0, %c0_0] : memref<8x128xf32, #tpu.memory_space<vmem>>, vector<8x128xf32>
    %1 = arith.truncf %0 : vector<8x128xf32> to vector<8x128xbf16>
    %c0_1 = arith.constant 0 : index
    %c0_2 = arith.constant 0 : index
    %2 = vector.load %arg2[%c0_1, %c0_2] : memref<128x512xbf16, #tpu.memory_space<vmem>>, vector<128x512xbf16>
    %cst = arith.constant dense<0.000000e+00> : vector<8x512xf32>
    %3 = tpu.matmul %1, %2, %cst {dimension_numbers = #tpu.dot_dimension_numbers<[1], [0], [0], [1], [0, 0, 1, 1], [], []>} : vector<8x128xbf16>, vector<128x512xbf16>, vector<8x512xf32> -> vector<8x512xf32>
    %c0_3 = arith.constant 0 : index
    %c0_4 = arith.constant 0 : index
    %4 = vector.load %arg3[%c0_3, %c0_4] : memref<1x512xf32, #tpu.memory_space<vmem>>, vector<1x512xf32>
    %5 = vector.broadcast %4 : vector<1x512xf32> to vector<8x512xf32>
    %6 = arith.addf %3, %5 : vector<8x512xf32>
    %cst_5 = arith.constant 0.000000e+00 : f32
    %7 = vector.broadcast %cst_5 : f32 to vector<8x512xf32>
    %8 = arith.maximumf %6, %7 : vector<8x512xf32>
    %9 = arith.truncf %8 : vector<8x512xf32> to vector<8x512xbf16>
    %c0_6 = arith.constant 0 : index
    %c0_7 = arith.constant 0 : index
    %10 = vector.load %arg4[%c0_6, %c0_7] : memref<512x128xbf16, #tpu.memory_space<vmem>>, vector<512x128xbf16>
    %cst_8 = arith.constant dense<0.000000e+00> : vector<8x128xf32>
    %11 = tpu.matmul %9, %10, %cst_8 {dimension_numbers = #tpu.dot_dimension_numbers<[1], [0], [0], [1], [0, 0, 1, 1], [], []>} : vector<8x512xbf16>, vector<512x128xbf16>, vector<8x128xf32> -> vector<8x128xf32>
    %c0_9 = arith.constant 0 : index
    %c0_10 = arith.constant 0 : index
    %12 = vector.load %arg5[%c0_9, %c0_10] : memref<1x128xf32, #tpu.memory_space<vmem>>, vector<1x128xf32>
    %13 = vector.broadcast %12 : vector<1x128xf32> to vector<8x128xf32>
    %14 = arith.addf %11, %13 : vector<8x128xf32>
    %c0_11 = arith.constant 0 : index
    %c0_12 = arith.constant 0 : index
    %15 = vector.load %arg6[%c0_11, %c0_12] : memref<8x128xf32, #tpu.memory_space<vmem>>, vector<8x128xf32>
    tpu.vector_store %arg6[%c0_11, %c0_12], %14 {strides = array<i32>} : memref<8x128xf32, #tpu.memory_space<vmem>>, vector<8x128xf32>,
    return
  }
  func.func @transform_0(%arg0: i32) -> (i32, i32) {
    %c0_i32 = arith.constant 0 : i32
    %c0_i32_0 = arith.constant 0 : i32
    return %arg0, %c0_i32 : i32, i32
  }
  func.func @transform_1(%arg0: i32) -> (i32, i32) {
    %c0_i32 = arith.constant 0 : i32
    %c0_i32_0 = arith.constant 0 : i32
    %c0_i32_1 = arith.constant 0 : i32
    return %c0_i32, %c0_i32_0 : i32, i32
  }
  func.func @transform_2(%arg0: i32) -> (i32, i32) {
    %c0_i32 = arith.constant 0 : i32
    %c0_i32_0 = arith.constant 0 : i32
    %c0_i32_1 = arith.constant 0 : i32
    return %c0_i32, %c0_i32_0 : i32, i32
  }
  func.func @transform_3(%arg0: i32) -> (i32, i32) {
    %c0_i32 = arith.constant 0 : i32
    %c0_i32_0 = arith.constant 0 : i32
    %c0_i32_1 = arith.constant 0 : i32
    return %c0_i32, %c0_i32_0 : i32, i32
  }
  func.func @transform_4(%arg0: i32) -> (i32, i32) {
    %c0_i32 = arith.constant 0 : i32
    %c0_i32_0 = arith.constant 0 : i32
    %c0_i32_1 = arith.constant 0 : i32
    return %c0_i32, %c0_i32_0 : i32, i32
  }
  func.func @transform_5(%arg0: i32) -> (i32, i32) {
    %c0_i32 = arith.constant 0 : i32
    %c0_i32_0 = arith.constant 0 : i32
    return %arg0, %c0_i32 : i32, i32
  }
}

</mosaic_0001>

<bundles_post_ra>
// kernel: tpu_custom_call.1
= control target key start
LH: loop header
LB: loop body
LE: loop exit
PB: predicated region body
PF: predicated region fallthrough
CT: control target
= control target key end

     0   :  { %10 = vsyncpa [#allocation3], 0  ;;  %s1105_s0 = inlined_call_operand.hbm [shape: f32[8,128], index: 0, kind: input, shape index: {}]   ;;  %s1106_s1 = inlined_call_operand.hbm [shape: bf16[128,512], index: 1, kind: input, shape index: {}]   ;;  %s1107_s2 = inlined_call_operand.hbm [shape: f32[1,512], index: 2, kind: input, shape index: {}]   ;;  %s1108_s3 = inlined_call_operand.hbm [shape: bf16[512,128], index: 3, kind: input, shape index: {}]   ;;  %s1109_s4 = inlined_call_operand.vmem [shape: f32[1,128], index: 4, kind: input, shape index: {}]   ;;  %s1110_s5 = inlined_call_operand.hbm [shape: f32[8,128], index: 5, kind: output, shape index: {}]  }
   0x1   :  { %11 = vsyncpa [#allocation6], 0 }
   0x2   :  { %12 = vsyncpa [#allocation9], 0 }
   0x3   :  { %13 = vsyncpa [#allocation4], 0  ;;  %s1047_s18 = smov [#allocation5]  }
   0x4   :  { %s29_s19 = sshll.u32 %s1047_s18, 4  ;;  %s30_s19 = int_to_ptr.vmem [resolvable:$true] %s29_s19 }
   0x5   :  { %s947_s20 = scalar_lea.vmem %s30_s19, 4096  ;;  %p952_p1 = scmp.lt.s32.totalorder %s30_s19, %s30_s19 }
   0x6   :  { %p948_p0 = scmp.ne.s32.totalorder %s30_s19, %s947_s20  ;;  %p953_p2 = scmp.lt.s32.totalorder %s947_s20, %s947_s20 }
   0x8   :  { %p954_p3 = por %p953_p2, %p952_p1 }
   0xa   :  { %p955_p4 = pnand %p954_p3, %p948_p0 }
   0xc   :  { %958 = shalt.err (!%p955_p4)
}
   0xd   :  { %s1048_s21 = smov 256   ;;  %s1049_s22 = smov 16  }
   0xe   :  { %35 = dma.hbm_to_vmem [thread:$0]  %s1106_s1, 4096, %s30_s19, [#allocation6], %s1048_s21, %s1048_s21, %s1049_s22  }
   0xf   :  { %s1050_s25 = smov [#allocation2]   ;;  %s1051_s27 = smov [#allocation7]  }
  0x10   :  { %s20_s26 = sshll.u32 %s1050_s25, 4  ;;  %s42_s28 = sshll.u32 %s1051_s27, 4  ;;  %s21_s26 = int_to_ptr.vmem [resolvable:$true] %s20_s26  ;;  %s43_s28 = int_to_ptr.vmem [resolvable:$true] %s42_s28 }
  0x11   :  { %s967_s29 = scalar_lea.vmem %s21_s26, 128  ;;  %p972_p6 = scmp.lt.s32.totalorder %s21_s26, %s21_s26 }
  0x12   :  { %p968_p5 = scmp.ne.s32.totalorder %s21_s26, %s967_s29  ;;  %p973_p7 = scmp.lt.s32.totalorder %s967_s29, %s967_s29 }
  0x14   :  { %p974_p8 = por %p973_p7, %p972_p6 }
  0x16   :  { %p975_p9 = pnand %p974_p8, %p968_p5 }
  0x18   :  { %978 = shalt.err (!%p975_p9)
}
  0x19   :  { %23 = dma.hbm_to_vmem [thread:$0]  %s1105_s0, 128, %s21_s26, [#allocation3]  }
  0x1a   :  { %s987_s7 = scalar_lea.vmem %s43_s28, 64  ;;  %p992_p11 = scmp.lt.s32.totalorder %s43_s28, %s43_s28 }
  0x1b   :  { %p988_p10 = scmp.ne.s32.totalorder %s43_s28, %s987_s7  ;;  %p993_p12 = scmp.lt.s32.totalorder %s987_s7, %s987_s7 }
  0x1d   :  { %p994_p13 = por %p993_p12, %p992_p11 }
  0x1f   :  { %p995_p0 = pnand %p994_p13, %p988_p10 }
  0x21   :  { %998 = shalt.err (!%p995_p0)
}
  0x22   :  { %45 = dma.hbm_to_vmem [thread:$0]  %s1107_s2, 64, %s43_s28, [#allocation6]  }
  0x23   :  { %s1052_s9 = smov [#allocation8]  }
  0x24   :  { %s51_s10 = sshll.u32 %s1052_s9, 4  ;;  %s52_s10 = int_to_ptr.vmem [resolvable:$true] %s51_s10 }
  0x25   :  { %s1007_s11 = scalar_lea.vmem %s52_s10, 4096  ;;  %p1012_p2 = scmp.lt.s32.totalorder %s52_s10, %s52_s10 }
  0x26   :  { %p1008_p1 = scmp.ne.s32.totalorder %s52_s10, %s1007_s11  ;;  %p1013_p3 = scmp.lt.s32.totalorder %s1007_s11, %s1007_s11 }
  0x28   :  { %p1014_p4 = por %p1013_p3, %p1012_p2 }
  0x2a   :  { %p1015_p5 = pnand %p1014_p4, %p1008_p1 }
  0x2c   :  { %1018 = shalt.err (!%p1015_p5)
}
  0x2d   :  { %s1053_s0 = smov 64   ;;  %s1054_s12 = smov 4  }
  0x2e   :  { %57 = dma.hbm_to_vmem [thread:$0]  %s1108_s3, 4096, %s52_s10, [#allocation9], %s1053_s0, %s1053_s0, %s1054_s12  }
  0x2f   :  { %1039 = dma.done.wait [#allocation3], 128  }
  0x30   :  { %1040 = vsyncadd [#allocation3], 4294967168 }
  0x31   :  { %1041 = dma.done.wait [#allocation6], 4160  }
  0x32   :  { %1042 = vsyncadd [#allocation6], 4294963136 }
  0x33   :  { %1043 = dma.done.wait [#allocation9], 4096  }
  0x34   :  { %1044 = vsyncadd [#allocation9], 4294963200  ;;  %v1055_v0 = vmov 0   ;;  %v859_v1 = vld [vmem:[#allocation5 + $0xe4] ss:$16 sps:$4 sm:$0xff]   ;;  %v73_v33 = vld [vmem:[#allocation2] sm:$0xff] }
  0x35   :  { %321 = vmatprep.mubr.bf16.mxu0 %v1055_v0  ;;  %362 = vmatprep.mubr.bf16.mxu1 %v1055_v0  ;;  %v861_v2 = vld [vmem:[#allocation5 + $0xec] ss:$16 sps:$4 sm:$0xff]   ;;  %v863_v3 = vld [vmem:[#allocation5 + $0xe0] ss:$16 sps:$4 sm:$0xff]   ;;  %v864_v4 = vld [vmem:[#allocation5 + $0xe8] ss:$16 sps:$4 sm:$0xff]   ;;  %v74_v37 = vpack.c.bf16 %v73_v33, %v73_v33 }
  0x36   :  { %289 = vmatprep.subr.bf16.mxu0 %v859_v1  ;;  %330 = vmatprep.subr.bf16.mxu1 %v861_v2  ;;  %v865_v5 = vld [vmem:[#allocation5 + $0xc4] ss:$16 sps:$4 sm:$0xff]   ;;  %v867_v6 = vld [vmem:[#allocation5 + $0xcc] ss:$16 sps:$4 sm:$0xff]   ;;  %v869_v7 = vld [vmem:[#allocation5 + $0xc0] ss:$16 sps:$4 sm:$0xff]  }
  0x37   :  { %290 = vmatpush1.bf16.msra.mxu0 %v863_v3  ;;  %331 = vmatpush1.bf16.msra.mxu1 %v864_v4  ;;  %v870_v8 = vld [vmem:[#allocation5 + $0xc8] ss:$16 sps:$4 sm:$0xff]   ;;  %v871_v9 = vld [vmem:[#allocation5 + $0xa4] ss:$16 sps:$4 sm:$0xff]   ;;  %v873_v10 = vld [vmem:[#allocation5 + $0xac] ss:$16 sps:$4 sm:$0xff]   ;;  %v109_v3 = vlaneseq }
  0x38   :  { %291 = vmatprep.subr.bf16.mxu0 %v865_v5  ;;  %332 = vmatprep.subr.bf16.mxu1 %v867_v6  ;;  %v875_v11 = vld [vmem:[#allocation5 + $0xa0] ss:$16 sps:$4 sm:$0xff]   ;;  %v876_v12 = vld [vmem:[#allocation5 + $0xa8] ss:$16 sps:$4 sm:$0xff]   ;;  %v877_v13 = vld [vmem:[#allocation5 + $0x84] ss:$16 sps:$4 sm:$0xff]  }
  0x39   :  { %v879_v14 = vld [vmem:[#allocation5 + $0x8c] ss:$16 sps:$4 sm:$0xff]   ;;  %v881_v15 = vld [vmem:[#allocation5 + $0x80] ss:$16 sps:$4 sm:$0xff]   ;;  %v882_v16 = vld [vmem:[#allocation5 + $0x88] ss:$16 sps:$4 sm:$0xff]  }
  0x3a   :  { %v883_v17 = vld [vmem:[#allocation5 + $0x64] ss:$16 sps:$4 sm:$0xff]   ;;  %v885_v18 = vld [vmem:[#allocation5 + $0x6c] ss:$16 sps:$4 sm:$0xff]   ;;  %v887_v19 = vld [vmem:[#allocation5 + $0x60] ss:$16 sps:$4 sm:$0xff]  }
  0x3b   :  { %292 = vmatpush1.bf16.msra.mxu0 %v869_v7  ;;  %333 = vmatpush1.bf16.msra.mxu1 %v870_v8  ;;  %v888_v20 = vld [vmem:[#allocation5 + $0x68] ss:$16 sps:$4 sm:$0xff]   ;;  %v889_v21 = vld [vmem:[#allocation5 + $0x44] ss:$16 sps:$4 sm:$0xff]   ;;  %v891_v22 = vld [vmem:[#allocation5 + $0x4c] ss:$16 sps:$4 sm:$0xff]  }
  0x3c   :  { %293 = vmatprep.subr.bf16.mxu0 %v871_v9  ;;  %334 = vmatprep.subr.bf16.mxu1 %v873_v10  ;;  %v893_v23 = vld [vmem:[#allocation5 + $0x40] ss:$16 sps:$4 sm:$0xff]   ;;  %v894_v24 = vld [vmem:[#allocation5 + $0x48] ss:$16 sps:$4 sm:$0xff]   ;;  %v895_v25 = vld [vmem:[#allocation5 + $0x24] ss:$16 sps:$4 sm:$0xff]  }
  0x3d   :  { %v897_v26 = vld [vmem:[#allocation5 + $0x2c] ss:$16 sps:$4 sm:$0xff]   ;;  %v899_v27 = vld [vmem:[#allocation5 + $0x20] ss:$16 sps:$4 sm:$0xff]   ;;  %v900_v28 = vld [vmem:[#allocation5 + $0x28] ss:$16 sps:$4 sm:$0xff]  }
  0x3e   :  { %v901_v29 = vld [vmem:[#allocation5 + $0x4] ss:$16 sps:$4 sm:$0xff]   ;;  %v903_v30 = vld [vmem:[#allocation5 + $0xc] ss:$16 sps:$4 sm:$0xff]   ;;  %v905_v31 = vld [vmem:[#allocation5] ss:$16 sps:$4 sm:$0xff]  }
  0x3f   :  { %294 = vmatpush1.bf16.msra.mxu0 %v875_v11  ;;  %335 = vmatpush1.bf16.msra.mxu1 %v876_v12  ;;  %v906_v32 = vld [vmem:[#allocation5 + $0x8] ss:$16 sps:$4 sm:$0xff]   ;;  %v907_v34 = vld [vmem:[#allocation8 + $0x78] sm:$0xff]   ;;  %v915_v43 = vld [vmem:[#allocation8 + $0x68] sm:$0xff]   ;;  %v110_v4 = vshrl.u32 %v109_v3, 7  ;;  %s1056_s15 = smov [#allocation10]  }
  0x40   :  { %295 = vmatprep.subr.bf16.mxu0 %v877_v13  ;;  %336 = vmatprep.subr.bf16.mxu1 %v879_v14  ;;  %v908_v35 = vld [vmem:[#allocation8 + $0xf8] sm:$0xff]   ;;  %v911_v39 = vld [vmem:[#allocation8 + $0x70] sm:$0xff]   ;;  %v916_v44 = vld [vmem:[#allocation8 + $0xe8] sm:$0xff]   ;;  %s729_s16 = sshll.u32 %s1056_s15, 4  ;;  %s730_s16 = int_to_ptr.vmem [resolvable:$true] %s729_s16 }
  0x41   :  { %v909_v36 = vld [vmem:[#allocation8 + $0x38] sm:$0xff]   ;;  %v912_v40 = vld [vmem:[#allocation8 + $0xf0] sm:$0xff]   ;;  %v917_v45 = vld [vmem:[#allocation8 + $0x28] sm:$0xff]   ;;  %v111_v5 = vsub.s32 0, %v110_v4  ;;  %v119_v6 = vsub.s32 2, %v110_v4  ;;  %v115_v8 = vsub.s32 1, %v110_v4  ;;  %p1024_p7 = scmp.lt.s32.totalorder %s730_s16, %s730_s16 }
  0x42   :  { %v910_v38 = vld [vmem:[#allocation8 + $0xb8] sm:$0xff]   ;;  %v913_v41 = vld [vmem:[#allocation8 + $0x30] sm:$0xff]   ;;  %v918_v46 = vld [vmem:[#allocation8 + $0xa8] sm:$0xff]   ;;  %v123_v9 = vsub.s32 3, %v110_v4  ;;  %s1019_s17 = scalar_lea.vmem %s730_s16, 128 }
  0x43   :  { %296 = vmatpush1.bf16.msra.mxu0 %v881_v15  ;;  %337 = vmatpush1.bf16.msra.mxu1 %v882_v16  ;;  %v914_v42 = vld [vmem:[#allocation8 + $0xb0] sm:$0xff]   ;;  %v919_v47 = vld [vmem:[#allocation8 + $0x60] sm:$0xff]   ;;  %v923_v51 = vld [vmem:[#allocation8 + $0x58] sm:$0xff]   ;;  %p1020_p6 = scmp.ne.s32.totalorder %s730_s16, %s1019_s17  ;;  %p1025_p8 = scmp.lt.s32.totalorder %s1019_s17, %s1019_s17 }
  0x44   :  { %297 = vmatprep.subr.bf16.mxu0 %v883_v17  ;;  %338 = vmatprep.subr.bf16.mxu1 %v885_v18  ;;  %v920_v48 = vld [vmem:[#allocation8 + $0xe0] sm:$0xff]   ;;  %v924_v52 = vld [vmem:[#allocation8 + $0xd8] sm:$0xff]   ;;  %v927_v55 = vld [vmem:[#allocation8 + $0x50] sm:$0xff]  }
  0x45   :  { %v921_v49 = vld [vmem:[#allocation8 + $0x20] sm:$0xff]   ;;  %v925_v53 = vld [vmem:[#allocation8 + $0x18] sm:$0xff]   ;;  %v928_v56 = vld [vmem:[#allocation8 + $0xd0] sm:$0xff]   ;;  %p1026_p9 = por %p1025_p8, %p1024_p7 }
  0x46   :  { %v922_v50 = vld [vmem:[#allocation8 + $0xa0] sm:$0xff]   ;;  %v926_v54 = vld [vmem:[#allocation8 + $0x98] sm:$0xff]   ;;  %v929_v57 = vld [vmem:[#allocation8 + $0x10] sm:$0xff]  }
  0x47   :  { %298 = vmatpush1.bf16.msra.mxu0 %v887_v19  ;;  %339 = vmatpush1.bf16.msra.mxu1 %v888_v20  ;;  %v930_v58 = vld [vmem:[#allocation8 + $0x90] sm:$0xff]   ;;  %v931_v59 = vld [vmem:[#allocation8 + $0x48] sm:$0xff]   ;;  %v935_v63 = vld [vmem:[#allocation8 + $0x40] sm:$0xff]   ;;  %p1027_p10 = pnand %p1026_p9, %p1020_p6 }
  0x48   :  { %299 = vmatprep.subr.bf16.mxu0 %v889_v21  ;;  %340 = vmatprep.subr.bf16.mxu1 %v891_v22  ;;  %v932_v60 = vld [vmem:[#allocation8 + $0xc8] sm:$0xff]   ;;  %v936_v0 = vld [vmem:[#allocation8 + $0xc0] sm:$0xff]   ;;  %v107_v7 = vld [vmem:[#allocation7] sm:$0xf] }
  0x49   :  { %v933_v61 = vld [vmem:[#allocation8 + $0x8] sm:$0xff]   ;;  %v937_v1 = vld [vmem:[#allocation8] sm:$0xff]   ;;  %v112_v10 = vrot.slane %v107_v7, %v111_v5  ;;  %v120_v11 = vrot.slane %v107_v7, %v119_v6  ;;  %v116_v12 = vrot.slane %v107_v7, %v115_v8  ;;  %v124_v13 = vrot.slane %v107_v7, %v123_v9 }
  0x4a   :  { %v934_v62 = vld [vmem:[#allocation8 + $0x88] sm:$0xff]   ;;  %v938_v2 = vld [vmem:[#allocation8 + $0x80] sm:$0xff]  }
  0x4b   :  { %300 = vmatpush1.bf16.msra.mxu0 %v893_v23  ;;  %341 = vmatpush1.bf16.msra.mxu1 %v894_v24 }
  0x4c   :  { %301 = vmatprep.subr.bf16.mxu0 %v895_v25  ;;  %342 = vmatprep.subr.bf16.mxu1 %v897_v26 }
  0x4f   :  { %302 = vmatpush1.bf16.msra.mxu0 %v899_v27  ;;  %343 = vmatpush1.bf16.msra.mxu1 %v900_v28 }
  0x50   :  { %303 = vmatprep.subr.bf16.mxu0 %v901_v29  ;;  %344 = vmatprep.subr.bf16.mxu1 %v903_v30 }
  0x53   :  { %304 = vmatpush1.bf16.msra.mxu0 %v905_v31  ;;  %345 = vmatpush1.bf16.msra.mxu1 %v906_v32 }
  0x54   :  { %805 = vmatprep.subr.bf16.mxu0 %v907_v34  ;;  %827 = vmatprep.subr.bf16.mxu1 %v908_v35 }
  0x56   :  { %322 = vmatmul.mubr.bf16.vlgmr.msra.gmra.mxu0 %v74_v37  ;;  %363 = vmatmul.mubr.bf16.vlgmr.msra.gmra.mxu1 %v74_v37 }
  0x57   :  { %806 = vmatpush3.bf16.msra.mxu0 %v909_v36  ;;  %828 = vmatpush3.bf16.msra.mxu1 %v910_v38  ;;  %v772_v36 = vld [vmem:[%s1109_s4] ss:$0 sm:$0xff] }
  0x58   :  { %807 = vmatprep.subr.bf16.mxu0 %v911_v39  ;;  %829 = vmatprep.subr.bf16.mxu1 %v912_v40 }
  0x5b   :  { %808 = vmatpush3.bf16.msra.mxu0 %v913_v41  ;;  %830 = vmatpush3.bf16.msra.mxu1 %v914_v42 }
  0x5c   :  { %809 = vmatprep.subr.bf16.mxu0 %v915_v43  ;;  %831 = vmatprep.subr.bf16.mxu1 %v916_v44 }
  0x5f   :  { %810 = vmatpush3.bf16.msra.mxu0 %v917_v45  ;;  %832 = vmatpush3.bf16.msra.mxu1 %v918_v46 }
  0x60   :  { %811 = vmatprep.subr.bf16.mxu0 %v919_v47  ;;  %833 = vmatprep.subr.bf16.mxu1 %v920_v48 }
  0x63   :  { %812 = vmatpush3.bf16.msra.mxu0 %v921_v49  ;;  %834 = vmatpush3.bf16.msra.mxu1 %v922_v50 }
  0x64   :  { %813 = vmatprep.subr.bf16.mxu0 %v923_v51  ;;  %835 = vmatprep.subr.bf16.mxu1 %v924_v52 }
  0x67   :  { %814 = vmatpush3.bf16.msra.mxu0 %v925_v53  ;;  %836 = vmatpush3.bf16.msra.mxu1 %v926_v54 }
  0x68   :  { %815 = vmatprep.subr.bf16.mxu0 %v927_v55  ;;  %837 = vmatprep.subr.bf16.mxu1 %v928_v56 }
  0x6b   :  { %816 = vmatpush3.bf16.msra.mxu0 %v929_v57  ;;  %838 = vmatpush3.bf16.msra.mxu1 %v930_v58 }
  0x6c   :  { %817 = vmatprep.subr.bf16.mxu0 %v931_v59  ;;  %839 = vmatprep.subr.bf16.mxu1 %v932_v60 }
  0x6f   :  { %818 = vmatpush3.bf16.msra.mxu0 %v933_v61  ;;  %840 = vmatpush3.bf16.msra.mxu1 %v934_v62 }
  0x70   :  { %819 = vmatprep.subr.bf16.mxu0 %v935_v63  ;;  %841 = vmatprep.subr.bf16.mxu1 %v936_v0 }
  0x73   :  { %820 = vmatpush3.bf16.msra.mxu0 %v937_v1  ;;  %842 = vmatpush3.bf16.msra.mxu1 %v938_v2 }
 0x116   :  { %v323_v14 = vpop.f32.mrf.mxu0  ;;  %v364_v15 = vpop.f32.mrf.mxu1 }
 0x117   :  { %v324_v16 = vadd.f32 %v323_v14, %v112_v10  ;;  %v365_v17 = vadd.f32 %v364_v15, %v120_v11 }
 0x118   :  { %v325_v18 = vpop.f32.mrf.mxu0  ;;  %v366_v19 = vpop.f32.mrf.mxu1 }
 0x119   :  { %v373_v20 = vmax.f32 %v365_v17, 0.0  ;;  %v326_v21 = vadd.f32 %v325_v18, %v116_v12  ;;  %v367_v22 = vadd.f32 %v366_v19, %v124_v13  ;;  %v371_v23 = vmax.f32 %v324_v16, 0.0 }
 0x11a   :  { %v327_v24 = vpop.f32.mrf.mxu0  ;;  %v368_v25 = vpop.f32.mrf.mxu1 }
 0x11b   :  { %v372_v26 = vmax.f32 %v326_v21, 0.0  ;;  %v374_v27 = vmax.f32 %v367_v22, 0.0  ;;  %v377_v28 = vpack.c.bf16 %v373_v20, %v373_v20  ;;  %v375_v33 = vpack.c.bf16 %v371_v23, %v371_v23 }
 0x11c   :  { %v328_v29 = vpop.f32.mrf.mxu0  ;;  %v369_v30 = vpop.f32.mrf.mxu1 }
 0x11d   :  { %v376_v31 = vpack.c.bf16 %v372_v26, %v372_v26  ;;  %v378_v32 = vpack.c.bf16 %v374_v27, %v374_v27 }
 0x11f   :  { %674 = vmatprep.mubr.bf16.mxu0 %v376_v31  ;;  %714 = vmatprep.mubr.bf16.mxu1 %v378_v32 }
 0x120   :  { %675 = vmatmul.mubr.bf16.vlgmr.msra.gmra.mxu0 %v375_v33  ;;  %715 = vmatmul.mubr.bf16.vlgmr.msra.gmra.mxu1 %v377_v28 }
 0x1e0   :  { %v821_v34 = vpop.f32.mrf.mxu0  ;;  %v843_v35 = vpop.f32.mrf.mxu1 }
 0x1e2   :  { %v822_v37 = vpop.f32.mrf.mxu0  ;;  %v844_v38 = vpop.f32.mrf.mxu1 }
 0x1e3   :  { %v823_v39 = vadd.f32 %v822_v37, %v821_v34  ;;  %v845_v43 = vadd.f32 %v844_v38, %v843_v35 }
 0x1e4   :  { %v824_v40 = vpop.f32.mrf.mxu0  ;;  %v846_v41 = vpop.f32.mrf.mxu1 }
 0x1e5   :  { %v677_v42 = vadd.f32 %v823_v39, %v772_v36 }
 0x1e6   :  { %v825_v44 = vpop.f32.mrf.mxu0  ;;  %v847_v45 = vpop.f32.mrf.mxu1 }
 0x1e7   :  { %v717_v46 = vadd.f32 %v845_v43, %v677_v42 }
 0x1e9   :  { %722 = vst [vmem:[#allocation10] sm:$0xff] %v717_v46 }
 0x1ea   :  { %1030 = shalt.err (!%p1027_p10)
}
 0x1eb   :  { %732 = dma.vmem_to_hbm [thread:$0]  %s730_s16, 128, %s1110_s5, [#allocation4]  }
 0x1ec   :  { %1045 = dma.done.wait [#allocation4], 128  }
 0x1ed   :  { %1046 = vsyncadd [#allocation4], 4294967168 }
 0x1ee   :  { %736 = vsyncpa [#allocation3], 1 }
 0x1ef   :  { %737 = vsyncpa [#allocation6], 1 }
 0x1f0   :  { %738 = vsyncpa [#allocation9], 1 }
 0x1f1   :  { %739 = vsyncpa [#allocation4], 1 }

</bundles_post_ra>
